<compile_context>
chip_gen: v7x
topology: tpu7x:2x2x1
jax: 0.10.0
libtpu: 0.0.40
codegen_flags: <defaults>
</compile_context>

<pallas_src>
import functools

import jax
import jax.numpy as jnp
from jax.experimental import pallas as pl
from jax.experimental.pallas import tpu as pltpu


def _max_grad_loss_kernel(fus_ref, rgb_ref, tir_ref, out_ref, pad_ref, *,
                          TB, H, W):
    """One grid step: TB single-channel images -> one partial |diff| sum."""
    Hp, Wp = H + 2, W + 2

    # Zero the padded scratch once per step; the three interior writes below
    # never touch the 1-px border, so it stays zero for all three planes.
    pad_ref[...] = jnp.zeros((TB, Hp, Wp), jnp.float32)

    def sobel_abs(src_ref):
        # In-kernel zero padding: write the (TB, H, W) block into the interior.
        pad_ref[:, 1:H + 1, 1:W + 1] = src_ref[...].astype(jnp.float32)
        xp = pad_ref[...]                                   # (TB, Hp, Wp)

        # Separable Sobel (cross-correlation, matches F.conv2d with padding=1):
        #   kernelx = [1,2,1]^T (rows) x [-1,0,1] (cols)
        #   kernely = [1,0,-1]^T (rows) x [ 1,2,1] (cols)
        # Vertical pass.
        t = xp[:, 0:H, :] + 2.0 * xp[:, 1:H + 1, :] + xp[:, 2:H + 2, :]  # smooth
        u = xp[:, 0:H, :] - xp[:, 2:H + 2, :]                            # deriv
        # Horizontal pass.
        sx = t[:, :, 2:W + 2] - t[:, :, 0:W]
        sy = u[:, :, 0:W] + 2.0 * u[:, :, 1:W + 1] + u[:, :, 2:W + 2]
        return jnp.abs(sx) + jnp.abs(sy)                    # (TB, H, W)

    fus_g = sobel_abs(fus_ref)
    rgb_g = sobel_abs(rgb_ref)
    tir_g = sobel_abs(tir_ref)

    diff = jnp.abs(fus_g - jnp.maximum(rgb_g, tir_g))
    out_ref[0, 0] = jnp.sum(diff)


def _pick_block_batch(N, H, W, budget_bytes=20 * 1024 * 1024):
    """Largest divisor of N whose working set stays well inside VMEM."""
    # Rough per-image VMEM cost: 3 planes x 2 pipeline buffers + padded
    # scratch + live f32 temporaries (t/u/sx/sy/grads/diff).
    per_img = 4 * H * W * 30
    tb_max = max(1, budget_bytes // max(per_img, 1))
    tb = 1
    for cand in range(1, min(N, tb_max) + 1):
        if N % cand == 0:
            tb = cand
    return tb


def max_grad_loss(im_fusion, im_rgb, im_tir, loss_weight=1.0):
    """im_* : (N, 1, H, W) float32 (NCHW, single channel). Returns scalar loss."""
    N, C, H, W = im_fusion.shape
    assert C == 1, "Sobelxy conv weight is (1,1,3,3); inputs must be single-channel"

    def prep(x):
        # Squeezing a size-1 dim is a metadata-only reshape (no pad pass).
        return jnp.squeeze(x, axis=1).astype(jnp.float32)    # (N, H, W)

    fus, rgb, tir = prep(im_fusion), prep(im_rgb), prep(im_tir)

    TB = _pick_block_batch(N, H, W)
    NB = N // TB

    kernel = functools.partial(_max_grad_loss_kernel, TB=TB, H=H, W=W)

    in_spec = pl.BlockSpec((TB, H, W), lambda b: (b, 0, 0))
    partials = pl.pallas_call(
        kernel,
        out_shape=jax.ShapeDtypeStruct((NB, 1), jnp.float32),
        grid_spec=pltpu.PrefetchScalarGridSpec(
            num_scalar_prefetch=0,
            grid=(NB,),
            in_specs=[in_spec, in_spec, in_spec],
            out_specs=pl.BlockSpec((1, 1), lambda b: (b, 0),
                                   memory_space=pltpu.SMEM),
            scratch_shapes=[pltpu.VMEM((TB, H + 2, W + 2), jnp.float32)],
        ),
        compiler_params=pltpu.CompilerParams(
            dimension_semantics=("parallel",),
            vmem_limit_bytes=32 * 1024 * 1024),
    )(fus, rgb, tir)

    # L1Loss mean over all N*C*H*W elements, then loss_weight scale.
    return jnp.sum(partials) * jnp.float32(float(loss_weight) / float(N * C * H * W))


def _reference(im_fusion, im_rgb, im_tir, loss_weight=1.0):
    """Pure-JAX reference mirroring the PyTorch module."""
    kx = jnp.array([[-1., 0., 1.], [-2., 0., 2.], [-1., 0., 1.]], jnp.float32)
    ky = jnp.array([[1., 2., 1.], [0., 0., 0.], [-1., -2., -1.]], jnp.float32)

    def sobel(x):  # x: (N,1,H,W)
        xp = jnp.pad(x[:, 0], ((0, 0), (1, 1), (1, 1)))
        H, W = x.shape[2], x.shape[3]
        sx = jnp.zeros((x.shape[0], H, W), jnp.float32)
        sy = jnp.zeros((x.shape[0], H, W), jnp.float32)
        for u in range(3):
            for v in range(3):
                sx = sx + kx[u, v] * xp[:, u:u + H, v:v + W]
                sy = sy + ky[u, v] * xp[:, u:u + H, v:v + W]
        return jnp.abs(sx) + jnp.abs(sy)

    rgb_g, tir_g, fus_g = sobel(im_rgb), sobel(im_tir), sobel(im_fusion)
    return loss_weight * jnp.mean(jnp.abs(fus_g - jnp.maximum(rgb_g, tir_g)))


if __name__ == "__main__":
    key = jax.random.PRNGKey(0)
    k1, k2, k3 = jax.random.split(key, 3)
    N, C, H, W = 2, 1, 16, 16
    im_fusion = jax.random.uniform(k1, (N, C, H, W), jnp.float32)
    im_rgb = jax.random.uniform(k2, (N, C, H, W), jnp.float32)
    im_tir = jax.random.uniform(k3, (N, C, H, W), jnp.float32)

    loss = jax.block_until_ready(max_grad_loss(im_fusion, im_rgb, im_tir, 1.0))
    ref = jax.block_until_ready(_reference(im_fusion, im_rgb, im_tir, 1.0))
    assert jnp.allclose(loss, ref, rtol=1e-5, atol=1e-5), (loss, ref)

    print("KERNEL_OK")
</pallas_src>

<mosaic_0001>
module attributes {stable_mosaic.version = 11 : i64} {
  func.func @_max_grad_loss_kernel(%arg0: i32, %arg1: memref<2x16x16xf32, #tpu.memory_space<vmem>>, %arg2: memref<2x16x16xf32, #tpu.memory_space<vmem>>, %arg3: memref<2x16x16xf32, #tpu.memory_space<vmem>>, %arg4: memref<1x1xf32, #tpu.memory_space<smem>>, %arg5: memref<2x18x18xf32, #tpu.memory_space<vmem>>) attributes {dimension_semantics = [#tpu.dimension_semantics<parallel>], iteration_bounds = array<i64: 1>, scalar_prefetch = 0 : i64, scratch_operands = 1 : i64, tpu.core_type = #tpu.core_type<tc>, window_params = [{transform_indices = @transform_0, window_bounds = array<i64: 2, 16, 16>}, {transform_indices = @transform_1, window_bounds = array<i64: 2, 16, 16>}, {transform_indices = @transform_2, window_bounds = array<i64: 2, 16, 16>}, {transform_indices = @transform_3, window_bounds = array<i64: 1, 1>}]} {
    %cst = arith.constant 0.000000e+00 : f32
    %0 = vector.broadcast %cst : f32 to vector<2x18x18xf32>
    %c0 = arith.constant 0 : index
    %c0_0 = arith.constant 0 : index
    %c0_1 = arith.constant 0 : index
    %1 = vector.load %arg5[%c0, %c0_0, %c0_1] : memref<2x18x18xf32, #tpu.memory_space<vmem>>, vector<2x18x18xf32>
    tpu.vector_store %arg5[%c0, %c0_0, %c0_1], %0 {strides = array<i32>} : memref<2x18x18xf32, #tpu.memory_space<vmem>>, vector<2x18x18xf32>,
    %c0_2 = arith.constant 0 : index
    %c0_3 = arith.constant 0 : index
    %c0_4 = arith.constant 0 : index
    %2 = vector.load %arg1[%c0_2, %c0_3, %c0_4] : memref<2x16x16xf32, #tpu.memory_space<vmem>>, vector<2x16x16xf32>
    %c0_5 = arith.constant 0 : index
    %c1 = arith.constant 1 : index
    %c1_6 = arith.constant 1 : index
    %3 = vector.load %arg5[%c0_5, %c1, %c1_6] : memref<2x18x18xf32, #tpu.memory_space<vmem>>, vector<2x16x16xf32>
    tpu.vector_store %arg5[%c0_5, %c1, %c1_6], %2 {strides = array<i32>} : memref<2x18x18xf32, #tpu.memory_space<vmem>>, vector<2x16x16xf32>,
    %c0_7 = arith.constant 0 : index
    %c0_8 = arith.constant 0 : index
    %c0_9 = arith.constant 0 : index
    %4 = vector.load %arg5[%c0_7, %c0_8, %c0_9] : memref<2x18x18xf32, #tpu.memory_space<vmem>>, vector<2x18x18xf32>
    %5 = vector.extract_strided_slice %4 {offsets = [0, 0, 0], sizes = [2, 16, 18], strides = [1, 1, 1]} : vector<2x18x18xf32> to vector<2x16x18xf32>
    %6 = vector.extract_strided_slice %4 {offsets = [0, 1, 0], sizes = [2, 16, 18], strides = [1, 1, 1]} : vector<2x18x18xf32> to vector<2x16x18xf32>
    %cst_10 = arith.constant 2.000000e+00 : f32
    %7 = vector.broadcast %cst_10 : f32 to vector<2x16x18xf32>
    %8 = arith.mulf %7, %6 : vector<2x16x18xf32>
    %9 = arith.addf %5, %8 : vector<2x16x18xf32>
    %10 = vector.extract_strided_slice %4 {offsets = [0, 2, 0], sizes = [2, 16, 18], strides = [1, 1, 1]} : vector<2x18x18xf32> to vector<2x16x18xf32>
    %11 = arith.addf %9, %10 : vector<2x16x18xf32>
    %12 = vector.extract_strided_slice %4 {offsets = [0, 0, 0], sizes = [2, 16, 18], strides = [1, 1, 1]} : vector<2x18x18xf32> to vector<2x16x18xf32>
    %13 = vector.extract_strided_slice %4 {offsets = [0, 2, 0], sizes = [2, 16, 18], strides = [1, 1, 1]} : vector<2x18x18xf32> to vector<2x16x18xf32>
    %14 = arith.subf %12, %13 : vector<2x16x18xf32>
    %15 = vector.extract_strided_slice %11 {offsets = [0, 0, 2], sizes = [2, 16, 16], strides = [1, 1, 1]} : vector<2x16x18xf32> to vector<2x16x16xf32>
    %16 = vector.extract_strided_slice %11 {offsets = [0, 0, 0], sizes = [2, 16, 16], strides = [1, 1, 1]} : vector<2x16x18xf32> to vector<2x16x16xf32>
    %17 = arith.subf %15, %16 : vector<2x16x16xf32>
    %18 = vector.extract_strided_slice %14 {offsets = [0, 0, 0], sizes = [2, 16, 16], strides = [1, 1, 1]} : vector<2x16x18xf32> to vector<2x16x16xf32>
    %19 = vector.extract_strided_slice %14 {offsets = [0, 0, 1], sizes = [2, 16, 16], strides = [1, 1, 1]} : vector<2x16x18xf32> to vector<2x16x16xf32>
    %cst_11 = arith.constant 2.000000e+00 : f32
    %20 = vector.broadcast %cst_11 : f32 to vector<2x16x16xf32>
    %21 = arith.mulf %20, %19 : vector<2x16x16xf32>
    %22 = arith.addf %18, %21 : vector<2x16x16xf32>
    %23 = vector.extract_strided_slice %14 {offsets = [0, 0, 2], sizes = [2, 16, 16], strides = [1, 1, 1]} : vector<2x16x18xf32> to vector<2x16x16xf32>
    %24 = arith.addf %22, %23 : vector<2x16x16xf32>
    %25 = math.absf %17 : vector<2x16x16xf32>
    %26 = math.absf %24 : vector<2x16x16xf32>
    %27 = arith.addf %25, %26 : vector<2x16x16xf32>
    %c0_12 = arith.constant 0 : index
    %c0_13 = arith.constant 0 : index
    %c0_14 = arith.constant 0 : index
    %28 = vector.load %arg2[%c0_12, %c0_13, %c0_14] : memref<2x16x16xf32, #tpu.memory_space<vmem>>, vector<2x16x16xf32>
    %c0_15 = arith.constant 0 : index
    %c1_16 = arith.constant 1 : index
    %c1_17 = arith.constant 1 : index
    %29 = vector.load %arg5[%c0_15, %c1_16, %c1_17] : memref<2x18x18xf32, #tpu.memory_space<vmem>>, vector<2x16x16xf32>
    tpu.vector_store %arg5[%c0_15, %c1_16, %c1_17], %28 {strides = array<i32>} : memref<2x18x18xf32, #tpu.memory_space<vmem>>, vector<2x16x16xf32>,
    %c0_18 = arith.constant 0 : index
    %c0_19 = arith.constant 0 : index
    %c0_20 = arith.constant 0 : index
    %30 = vector.load %arg5[%c0_18, %c0_19, %c0_20] : memref<2x18x18xf32, #tpu.memory_space<vmem>>, vector<2x18x18xf32>
    %31 = vector.extract_strided_slice %30 {offsets = [0, 0, 0], sizes = [2, 16, 18], strides = [1, 1, 1]} : vector<2x18x18xf32> to vector<2x16x18xf32>
    %32 = vector.extract_strided_slice %30 {offsets = [0, 1, 0], sizes = [2, 16, 18], strides = [1, 1, 1]} : vector<2x18x18xf32> to vector<2x16x18xf32>
    %cst_21 = arith.constant 2.000000e+00 : f32
    %33 = vector.broadcast %cst_21 : f32 to vector<2x16x18xf32>
    %34 = arith.mulf %33, %32 : vector<2x16x18xf32>
    %35 = arith.addf %31, %34 : vector<2x16x18xf32>
    %36 = vector.extract_strided_slice %30 {offsets = [0, 2, 0], sizes = [2, 16, 18], strides = [1, 1, 1]} : vector<2x18x18xf32> to vector<2x16x18xf32>
    %37 = arith.addf %35, %36 : vector<2x16x18xf32>
    %38 = vector.extract_strided_slice %30 {offsets = [0, 0, 0], sizes = [2, 16, 18], strides = [1, 1, 1]} : vector<2x18x18xf32> to vector<2x16x18xf32>
    %39 = vector.extract_strided_slice %30 {offsets = [0, 2, 0], sizes = [2, 16, 18], strides = [1, 1, 1]} : vector<2x18x18xf32> to vector<2x16x18xf32>
    %40 = arith.subf %38, %39 : vector<2x16x18xf32>
    %41 = vector.extract_strided_slice %37 {offsets = [0, 0, 2], sizes = [2, 16, 16], strides = [1, 1, 1]} : vector<2x16x18xf32> to vector<2x16x16xf32>
    %42 = vector.extract_strided_slice %37 {offsets = [0, 0, 0], sizes = [2, 16, 16], strides = [1, 1, 1]} : vector<2x16x18xf32> to vector<2x16x16xf32>
    %43 = arith.subf %41, %42 : vector<2x16x16xf32>
    %44 = vector.extract_strided_slice %40 {offsets = [0, 0, 0], sizes = [2, 16, 16], strides = [1, 1, 1]} : vector<2x16x18xf32> to vector<2x16x16xf32>
    %45 = vector.extract_strided_slice %40 {offsets = [0, 0, 1], sizes = [2, 16, 16], strides = [1, 1, 1]} : vector<2x16x18xf32> to vector<2x16x16xf32>
    %cst_22 = arith.constant 2.000000e+00 : f32
    %46 = vector.broadcast %cst_22 : f32 to vector<2x16x16xf32>
    %47 = arith.mulf %46, %45 : vector<2x16x16xf32>
    %48 = arith.addf %44, %47 : vector<2x16x16xf32>
    %49 = vector.extract_strided_slice %40 {offsets = [0, 0, 2], sizes = [2, 16, 16], strides = [1, 1, 1]} : vector<2x16x18xf32> to vector<2x16x16xf32>
    %50 = arith.addf %48, %49 : vector<2x16x16xf32>
    %51 = math.absf %43 : vector<2x16x16xf32>
    %52 = math.absf %50 : vector<2x16x16xf32>
    %53 = arith.addf %51, %52 : vector<2x16x16xf32>
    %c0_23 = arith.constant 0 : index
    %c0_24 = arith.constant 0 : index
    %c0_25 = arith.constant 0 : index
    %54 = vector.load %arg3[%c0_23, %c0_24, %c0_25] : memref<2x16x16xf32, #tpu.memory_space<vmem>>, vector<2x16x16xf32>
    %c0_26 = arith.constant 0 : index
    %c1_27 = arith.constant 1 : index
    %c1_28 = arith.constant 1 : index
    %55 = vector.load %arg5[%c0_26, %c1_27, %c1_28] : memref<2x18x18xf32, #tpu.memory_space<vmem>>, vector<2x16x16xf32>
    tpu.vector_store %arg5[%c0_26, %c1_27, %c1_28], %54 {strides = array<i32>} : memref<2x18x18xf32, #tpu.memory_space<vmem>>, vector<2x16x16xf32>,
    %c0_29 = arith.constant 0 : index
    %c0_30 = arith.constant 0 : index
    %c0_31 = arith.constant 0 : index
    %56 = vector.load %arg5[%c0_29, %c0_30, %c0_31] : memref<2x18x18xf32, #tpu.memory_space<vmem>>, vector<2x18x18xf32>
    %57 = vector.extract_strided_slice %56 {offsets = [0, 0, 0], sizes = [2, 16, 18], strides = [1, 1, 1]} : vector<2x18x18xf32> to vector<2x16x18xf32>
    %58 = vector.extract_strided_slice %56 {offsets = [0, 1, 0], sizes = [2, 16, 18], strides = [1, 1, 1]} : vector<2x18x18xf32> to vector<2x16x18xf32>
    %cst_32 = arith.constant 2.000000e+00 : f32
    %59 = vector.broadcast %cst_32 : f32 to vector<2x16x18xf32>
    %60 = arith.mulf %59, %58 : vector<2x16x18xf32>
    %61 = arith.addf %57, %60 : vector<2x16x18xf32>
    %62 = vector.extract_strided_slice %56 {offsets = [0, 2, 0], sizes = [2, 16, 18], strides = [1, 1, 1]} : vector<2x18x18xf32> to vector<2x16x18xf32>
    %63 = arith.addf %61, %62 : vector<2x16x18xf32>
    %64 = vector.extract_strided_slice %56 {offsets = [0, 0, 0], sizes = [2, 16, 18], strides = [1, 1, 1]} : vector<2x18x18xf32> to vector<2x16x18xf32>
    %65 = vector.extract_strided_slice %56 {offsets = [0, 2, 0], sizes = [2, 16, 18], strides = [1, 1, 1]} : vector<2x18x18xf32> to vector<2x16x18xf32>
    %66 = arith.subf %64, %65 : vector<2x16x18xf32>
    %67 = vector.extract_strided_slice %63 {offsets = [0, 0, 2], sizes = [2, 16, 16], strides = [1, 1, 1]} : vector<2x16x18xf32> to vector<2x16x16xf32>
    %68 = vector.extract_strided_slice %63 {offsets = [0, 0, 0], sizes = [2, 16, 16], strides = [1, 1, 1]} : vector<2x16x18xf32> to vector<2x16x16xf32>
    %69 = arith.subf %67, %68 : vector<2x16x16xf32>
    %70 = vector.extract_strided_slice %66 {offsets = [0, 0, 0], sizes = [2, 16, 16], strides = [1, 1, 1]} : vector<2x16x18xf32> to vector<2x16x16xf32>
    %71 = vector.extract_strided_slice %66 {offsets = [0, 0, 1], sizes = [2, 16, 16], strides = [1, 1, 1]} : vector<2x16x18xf32> to vector<2x16x16xf32>
    %cst_33 = arith.constant 2.000000e+00 : f32
    %72 = vector.broadcast %cst_33 : f32 to vector<2x16x16xf32>
    %73 = arith.mulf %72, %71 : vector<2x16x16xf32>
    %74 = arith.addf %70, %73 : vector<2x16x16xf32>
    %75 = vector.extract_strided_slice %66 {offsets = [0, 0, 2], sizes = [2, 16, 16], strides = [1, 1, 1]} : vector<2x16x18xf32> to vector<2x16x16xf32>
    %76 = arith.addf %74, %75 : vector<2x16x16xf32>
    %77 = math.absf %69 : vector<2x16x16xf32>
    %78 = math.absf %76 : vector<2x16x16xf32>
    %79 = arith.addf %77, %78 : vector<2x16x16xf32>
    %80 = arith.maximumf %53, %79 : vector<2x16x16xf32>
    %81 = arith.subf %27, %80 : vector<2x16x16xf32>
    %82 = math.absf %81 : vector<2x16x16xf32>
    %83 = vector.shape_cast %82 : vector<2x16x16xf32> to vector<1x2x16x16xf32>
    %cst_34 = arith.constant dense<0.000000e+00> : vector<1xf32>
    %84 = vector.multi_reduction <add>, %83, %cst_34 [1, 2, 3] : vector<1x2x16x16xf32> to vector<1xf32>
    %85 = vector.shape_cast %84 : vector<1xf32> to vector<1x1x1x1xf32>
    %86 = vector.extract %85[0, 0, 0, 0] : f32 from vector<1x1x1x1xf32>
    %c0_35 = arith.constant 0 : index
    %c0_36 = arith.constant 0 : index
    %87 = memref.load %arg4[%c0_35, %c0_36] : memref<1x1xf32, #tpu.memory_space<smem>>
    memref.store %86, %arg4[%c0_35, %c0_36] : memref<1x1xf32, #tpu.memory_space<smem>>
    return
  }
  func.func @transform_0(%arg0: i32) -> (i32, i32, i32) {
    %c0_i32 = arith.constant 0 : i32
    %c0_i32_0 = arith.constant 0 : i32
    %c0_i32_1 = arith.constant 0 : i32
    return %arg0, %c0_i32, %c0_i32_0 : i32, i32, i32
  }
  func.func @transform_1(%arg0: i32) -> (i32, i32, i32) {
    %c0_i32 = arith.constant 0 : i32
    %c0_i32_0 = arith.constant 0 : i32
    %c0_i32_1 = arith.constant 0 : i32
    return %arg0, %c0_i32, %c0_i32_0 : i32, i32, i32
  }
  func.func @transform_2(%arg0: i32) -> (i32, i32, i32) {
    %c0_i32 = arith.constant 0 : i32
    %c0_i32_0 = arith.constant 0 : i32
    %c0_i32_1 = arith.constant 0 : i32
    return %arg0, %c0_i32, %c0_i32_0 : i32, i32, i32
  }
  func.func @transform_3(%arg0: i32) -> (i32, i32) {
    %c0_i32 = arith.constant 0 : i32
    %c0_i32_0 = arith.constant 0 : i32
    return %arg0, %c0_i32 : i32, i32
  }
}

</mosaic_0001>

<bundles_post_ra>
// kernel: tpu_custom_call.1
= control target key start
LH: loop header
LB: loop body
LE: loop exit
PB: predicated region body
PF: predicated region fallthrough
CT: control target
= control target key end

     0   :  { %8 = vsyncpa [#allocation4], 0  ;;  %s1199_s0 = inlined_call_operand.hbm [shape: f32[2,16,16], index: 0, kind: input, shape index: {}]   ;;  %s1200_s1 = inlined_call_operand.hbm [shape: f32[2,16,16], index: 1, kind: input, shape index: {}]   ;;  %s1201_s2 = inlined_call_operand.hbm [shape: f32[2,16,16], index: 2, kind: input, shape index: {}]   ;;  %s1202_s3 = inlined_call_operand.hbm [shape: f32[1,1], index: 3, kind: output, shape index: {}]  }
   0x1   :  { %9 = vsyncpa [#allocation7], 0 }
   0x2   :  { %10 = vsyncpa [#allocation5], 0  ;;  %s764_s12 = smov [#allocation6]   ;;  %s765_s14 = smov [#allocation3]  }
   0x3   :  { %s28_s13 = sshll.u32 %s764_s12, 4  ;;  %s16_s15 = sshll.u32 %s765_s14, 4  ;;  %s29_s13 = int_to_ptr.vmem [resolvable:$true] %s28_s13  ;;  %s795_s15 = int_to_ptr.vmem [resolvable:$true] %s16_s15 }
   0x4   :  { %s682_s18 = scalar_lea.hbm %s1200_s1, 512 }
   0x5   :  { %p683_p0 = scmp.ne.s32.totalorder %s1200_s1, %s682_s18  ;;  %p686_p1 = scmp.lt.u32.totalorder %s682_s18, %s1200_s1 }
   0x7   :  { %p688_p2 = pnand %p686_p1, %p683_p0 }
   0x9   :  { %691 = shalt.err (!%p688_p2)
}
   0xa   :  { %s692_s23 = scalar_lea.vmem %s29_s13, 512  ;;  %p697_p4 = scmp.lt.s32.totalorder %s29_s13, %s29_s13 }
   0xb   :  { %p693_p3 = scmp.ne.s32.totalorder %s29_s13, %s692_s23  ;;  %p698_p5 = scmp.lt.s32.totalorder %s692_s23, %s692_s23 }
   0xd   :  { %p699_p6 = por %p698_p5, %p697_p4 }
   0xf   :  { %p700_p7 = pnand %p699_p6, %p693_p3 }
  0x11   :  { %703 = shalt.err (!%p700_p7)
}
  0x12   :  { %s766_s24 = smov 128   ;;  %s767_s25 = smov 8  }
  0x13   :  { %34 = dma.hbm_to_vmem [thread:$0]  %s1200_s1, 512, %s29_s13, [#allocation7], %s766_s24, %s766_s24, %s767_s25  }
  0x14   :  { %s704_s30 = scalar_lea.hbm %s1199_s0, 512 }
  0x15   :  { %p705_p8 = scmp.ne.s32.totalorder %s1199_s0, %s704_s30  ;;  %p708_p9 = scmp.lt.u32.totalorder %s704_s30, %s1199_s0 }
  0x17   :  { %p710_p10 = pnand %p708_p9, %p705_p8 }
  0x19   :  { %713 = shalt.err (!%p710_p10)
}
  0x1a   :  { %s714_s8 = scalar_lea.vmem %s795_s15, 512  ;;  %p719_p12 = scmp.lt.s32.totalorder %s795_s15, %s795_s15 }
  0x1b   :  { %p715_p11 = scmp.ne.s32.totalorder %s795_s15, %s714_s8  ;;  %p720_p13 = scmp.lt.s32.totalorder %s714_s8, %s714_s8 }
  0x1d   :  { %p721_p0 = por %p720_p13, %p719_p12 }
  0x1f   :  { %p722_p1 = pnand %p721_p0, %p715_p11 }
  0x21   :  { %725 = shalt.err (!%p722_p1)
}
  0x22   :  { %22 = dma.hbm_to_vmem [thread:$0]  %s1199_s0, 512, %s795_s15, [#allocation4], %s766_s24, %s766_s24, %s767_s25  }
  0x23   :  { %s768_s10 = smov [#allocation8]   ;;  %s726_s14 = scalar_lea.hbm %s1201_s2, 512 }
  0x24   :  { %s40_s11 = sshll.u32 %s768_s10, 4  ;;  %p727_p2 = scmp.ne.s32.totalorder %s1201_s2, %s726_s14  ;;  %s41_s11 = int_to_ptr.vmem [resolvable:$true] %s40_s11 }
  0x25   :  { %p730_p3 = scmp.lt.u32.totalorder %s726_s14, %s1201_s2 }
  0x27   :  { %p732_p4 = pnand %p730_p3, %p727_p2 }
  0x29   :  { %735 = shalt.err (!%p732_p4)
}
  0x2a   :  { %s736_s20 = scalar_lea.vmem %s41_s11, 512  ;;  %p741_p6 = scmp.lt.s32.totalorder %s41_s11, %s41_s11 }
  0x2b   :  { %p737_p5 = scmp.ne.s32.totalorder %s41_s11, %s736_s20  ;;  %p742_p7 = scmp.lt.s32.totalorder %s736_s20, %s736_s20 }
  0x2d   :  { %p743_p8 = por %p742_p7, %p741_p6 }
  0x2f   :  { %p744_p9 = pnand %p743_p8, %p737_p5 }
  0x31   :  { %747 = shalt.err (!%p744_p9)
}
  0x32   :  { %46 = dma.hbm_to_vmem [thread:$0]  %s1201_s2, 512, %s41_s11, [#allocation7], %s766_s24, %s766_s24, %s767_s25  }
  0x33   :  { %758 = dma.done.wait [#allocation4], 512  }
  0x34   :  { %759 = vsyncadd [#allocation4], 4294966784 }
  0x35   :  { %760 = dma.done.wait [#allocation7], 1024  }
  0x36   :  { %761 = vsyncadd [#allocation7], 4294966272  ;;  %vm56_vm0 = vcmask 146432   ;;  %v769_v0 = vmov 0.0   ;;  %vm59_vm1 = vcmask 140288   ;;  %v66_v1 = vld [vmem:[#allocation3 + $0x10] sm:$0xff] }
  0x37   :  { %61 = vst.msk [vmem:[#allocation2 + $0x18] sm:$0xff] %vm56_vm0, %v769_v0  ;;  %62 = vst.msk [vmem:[#allocation2 + $0x20] sm:$0xff] %vm56_vm0, %v769_v0  ;;  %v64_v2 = vld [vmem:[#allocation3] sm:$0xff]  ;;  %s770_s21 = smov 1   ;;  %v67_v3 = vld [vmem:[#allocation3 + $0x18] sm:$0xff]  ;;  %vm84_vm2 = vcmask 138248  }
  0x38   :  { %57 = vst.msk [vmem:[#allocation2] sm:$0xff] %vm56_vm0, %v769_v0  ;;  %58 = vst.msk [vmem:[#allocation2 + $0x8] sm:$0xff] %vm56_vm0, %v769_v0  ;;  %76 = vrot.lane.b32.xlu1 %v66_v1, %s770_s21  ;;  %72 = vrot.lane.b32.xlu0 %v64_v2, %s770_s21  ;;  %v65_v4 = vld [vmem:[#allocation3 + $0x8] sm:$0xff]  ;;  %v247_v6 = vld [vmem:[#allocation6] sm:$0xff]  ;;  %vm132_vm3 = vcmask 1045504   ;;  %s771_s2 = smov 126  }
  0x39   :  { %63 = vst.msk [vmem:[#allocation2 + $0x28] sm:$0x3] %vm59_vm1, %v769_v0  ;;  %60 = vst.msk [vmem:[#allocation2 + $0x10] sm:$0x3] %vm59_vm1, %v769_v0  ;;  %v248_v5 = vld [vmem:[#allocation6 + $0x8] sm:$0xff]  ;;  %v250_v7 = vld [vmem:[#allocation6 + $0x18] sm:$0xff] }
  0x3a   :  { %v249_v8 = vld [vmem:[#allocation6 + $0x10] sm:$0xff]  ;;  %v428_v9 = vld [vmem:[#allocation8 + $0x8] sm:$0xff]  ;;  %v427_v10 = vld [vmem:[#allocation8] sm:$0xff]  ;;  %s772_s22 = smov 127   ;;  %vm107_vm4 = vcmask 1046528   ;;  %s773_s23 = smov 2  }
  0x3b   :  { %v430_v11 = vld [vmem:[#allocation8 + $0x18] sm:$0xff]  ;;  %v429_v12 = vld [vmem:[#allocation8 + $0x10] sm:$0xff]  ;;  %vm635_vm5 = vcmask 130048   ;;  %s748_s27 = scalar_lea.hbm %s1202_s3, 16 }
  0x3c   :  { %78 = vrot.lane.b32.xlu1 %v67_v3, %s770_s21  ;;  %74 = vrot.lane.b32.xlu0 %v65_v4, %s770_s21  ;;  %p749_p10 = scmp.ne.s32.totalorder %s1202_s3, %s748_s27  ;;  %p752_p11 = scmp.lt.u32.totalorder %s748_s27, %s1202_s3 }
  0x3e   :  { %p754_p12 = pnand %p752_p11, %p749_p10 }
  0x40   :  { %257 = vrot.lane.b32.xlu1 %v248_v5, %s770_s21  ;;  %255 = vrot.lane.b32.xlu0 %v247_v6, %s770_s21 }
  0x44   :  { %261 = vrot.lane.b32.xlu1 %v250_v7, %s770_s21  ;;  %259 = vrot.lane.b32.xlu0 %v249_v8, %s770_s21 }
  0x48   :  { %437 = vrot.lane.b32.xlu1 %v428_v9, %s770_s21  ;;  %435 = vrot.lane.b32.xlu0 %v427_v10, %s770_s21 }
  0x4c   :  { %441 = vrot.lane.b32.xlu1 %v430_v11, %s770_s21  ;;  %439 = vrot.lane.b32.xlu0 %v429_v12, %s770_s21 }
  0xaa   :  { %v77_v13 = vpop.permute.xlu1 %76  ;;  %v73_v14 = vpop.permute.xlu0 %72 }
  0xab   :  { %87 = vst.msk [vmem:[#allocation2 + $0x19] sm:$0xff] %vm84_vm2, %v77_v13  ;;  %85 = vst.msk [vmem:[#allocation2 + $0x1] sm:$0xff] %vm84_vm2, %v73_v14 }
  0xae   :  { %v79_v15 = vpop.permute.xlu1 %78  ;;  %v75_v16 = vpop.permute.xlu0 %74 }
  0xaf   :  { %88 = vst.msk [vmem:[#allocation2 + $0x21] sm:$0xff] %vm84_vm2, %v79_v15  ;;  %86 = vst.msk [vmem:[#allocation2 + $0x9] sm:$0xff] %vm84_vm2, %v75_v16 }
  0xb2   :  { %v258_v17 = vpop.permute.xlu1 %257  ;;  %v256_v18 = vpop.permute.xlu0 %255  ;;  %v851_v19 = vld [vmem:[#allocation2] sm:$0xff]  ;;  %v853_v20 = vld [vmem:[#allocation2 + $0x18] sm:$0xff] }
  0xb3   :  { %v133_v26 = vrot.slane %v851_v19, 2  ;;  %v138_v31 = vrot.slane %v853_v20, 2 }
  0xb6   :  { %v855_v21 = vld [vmem:[#allocation2 + $0x8] sm:$0xff]  ;;  %v857_v22 = vld [vmem:[#allocation2 + $0x10] sm:$0x3]  ;;  %v262_v23 = vpop.permute.xlu1 %261  ;;  %v859_v24 = vld [vmem:[#allocation2 + $0x20] sm:$0xff]  ;;  %v260_v25 = vpop.permute.xlu0 %259 }
  0xb7   :  { %268 = vst.msk [vmem:[#allocation2 + $0x9] sm:$0xff] %vm84_vm2, %v258_v17  ;;  %267 = vst.msk [vmem:[#allocation2 + $0x1] sm:$0xff] %vm84_vm2, %v256_v18  ;;  %v864_v27 = vld [vmem:[#allocation2 + $0x28] sm:$0x3]  ;;  %v134_v28 = vrot.slane %v855_v21, 2  ;;  %v136_v29 = vrot.slane %v857_v22, 2 }
  0xb8   :  { %269 = vst.msk [vmem:[#allocation2 + $0x19] sm:$0xff] %vm84_vm2, %v260_v25  ;;  %v139_v30 = vrot.slane %v859_v24, 2  ;;  %270 = vst.msk [vmem:[#allocation2 + $0x21] sm:$0xff] %vm84_vm2, %v262_v23  ;;  %v141_v32 = vrot.slane %v864_v27, 2 }
  0xb9   :  { %v874_v33 = vsel %vm132_vm3, %v134_v28, %v136_v29  ;;  %v877_v34 = vsel %vm132_vm3, %v133_v26, %v134_v28 }
  0xba   :  { %v881_v35 = vsub.f32 %v855_v21, %v874_v33  ;;  %v885_v36 = vsub.f32 %v851_v19, %v877_v34  ;;  %v438_v37 = vpop.permute.xlu1 %437  ;;  %v436_v38 = vpop.permute.xlu0 %435  ;;  %v888_v39 = vsel %vm132_vm3, %v139_v30, %v141_v32  ;;  %v891_v40 = vsel %vm132_vm3, %v138_v31, %v139_v30 }
  0xbb   :  { %v901_v43 = vsub.f32 %v859_v24, %v888_v39  ;;  %v905_v44 = vsub.f32 %v853_v20, %v891_v40 }
  0xbc   :  { %205 = vrot.lane.b32.xlu0 %v881_v35, %s771_s2  ;;  %203 = vrot.lane.b32.xlu1 %v885_v36, %s771_s2  ;;  %v176_v41 = vmul.f32 2.0, %v881_v35  ;;  %v175_v42 = vmul.f32 2.0, %v885_v36 }
  0xbd   :  { %v178_v56 = vmul.f32 2.0, %v901_v43  ;;  %v177_v57 = vmul.f32 2.0, %v905_v44 }
  0xbe   :  { %v907_v45 = vld [vmem:[#allocation2] sm:$0xff]  ;;  %v909_v46 = vld [vmem:[#allocation2 + $0x8] sm:$0xff]  ;;  %v911_v47 = vld [vmem:[#allocation2 + $0x10] sm:$0x3]  ;;  %v442_v48 = vpop.permute.xlu1 %441  ;;  %v440_v49 = vpop.permute.xlu0 %439 }
  0xbf   :  { %v313_v50 = vrot.slane %v907_v45, 2  ;;  %v314_v51 = vrot.slane %v909_v46, 2  ;;  %447 = vst.msk [vmem:[#allocation2 + $0x1] sm:$0xff] %vm84_vm2, %v436_v38  ;;  %v316_v52 = vrot.slane %v911_v47, 2  ;;  %448 = vst.msk [vmem:[#allocation2 + $0x9] sm:$0xff] %vm84_vm2, %v438_v37  ;;  %v918_v53 = vld [vmem:[#allocation2 + $0x20] sm:$0xff] }
  0xc0   :  { %v920_v54 = vld [vmem:[#allocation2 + $0x28] sm:$0x3]  ;;  %185 = vrot.lane.b32.xlu1 %v176_v41, %s772_s22  ;;  %183 = vrot.lane.b32.xlu0 %v175_v42, %s772_s22  ;;  %v925_v55 = vld [vmem:[#allocation2 + $0x18] sm:$0xff]  ;;  %v319_v58 = vrot.slane %v918_v53, 2  ;;  %v278_v32 = vmul.f32 2.0, %v909_v46  ;;  %v279_v41 = vmul.f32 2.0, %v911_v47 }
  0xc1   :  { %450 = vst.msk [vmem:[#allocation2 + $0x21] sm:$0xff] %vm84_vm2, %v442_v48  ;;  %449 = vst.msk [vmem:[#allocation2 + $0x19] sm:$0xff] %vm84_vm2, %v440_v49  ;;  %v932_v59 = vsel %vm132_vm3, %v313_v50, %v314_v51  ;;  %v935_v60 = vsel %vm132_vm3, %v314_v51, %v316_v52  ;;  %v318_v61 = vrot.slane %v925_v55, 2  ;;  %v321_v62 = vrot.slane %v920_v54, 2 }
  0xc2   :  { %v943_v63 = vsub.f32 %v907_v45, %v932_v59  ;;  %v947_v0 = vsub.f32 %v909_v46, %v935_v60  ;;  %v277_v48 = vmul.f32 2.0, %v907_v45  ;;  %v290_v49 = vrot.slane %v278_v32, 1 }
  0xc3   :  { %v954_v3 = vsel %vm132_vm3, %v318_v61, %v319_v58  ;;  %v957_v4 = vsel %vm132_vm3, %v319_v58, %v321_v62  ;;  %v96_v50 = vmul.f32 2.0, %v855_v21  ;;  %v97_v51 = vmul.f32 2.0, %v857_v22 }
  0xc4   :  { %189 = vrot.lane.b32.xlu1 %v178_v56, %s772_s22  ;;  %187 = vrot.lane.b32.xlu0 %v177_v57, %s772_s22  ;;  %v356_v7 = vmul.f32 2.0, %v947_v0  ;;  %v968_v8 = vsub.f32 %v925_v55, %v954_v3  ;;  %v972_v9 = vsub.f32 %v918_v53, %v957_v4  ;;  %v355_v12 = vmul.f32 2.0, %v943_v63 }
  0xc5   :  { %v292_v57 = vrot.slane %v279_v41, 1  ;;  %v289_v58 = vrot.slane %v277_v48, 1  ;;  %v95_v61 = vmul.f32 2.0, %v851_v19 }
  0xc6   :  { %v949_v1 = vld [vmem:[#allocation2 + $0x8] sm:$0xff]  ;;  %v951_v2 = vld [vmem:[#allocation2 + $0x10] sm:$0x3]  ;;  %v358_v11 = vmul.f32 2.0, %v972_v9  ;;  %v982_v13 = vld [vmem:[#allocation2] sm:$0xff]  ;;  %v357_v16 = vmul.f32 2.0, %v968_v8 }
  0xc7   :  { %v494_v5 = vrot.slane %v949_v1, 2  ;;  %v496_v6 = vrot.slane %v951_v2, 2  ;;  %v493_v14 = vrot.slane %v982_v13, 2  ;;  %v293_v22 = vsel %vm107_vm4, %v290_v49, %v292_v57 }
  0xc8   :  { %383 = vrot.lane.b32.xlu1 %v943_v63, %s771_s2  ;;  %385 = vrot.lane.b32.xlu0 %v947_v0, %s771_s2  ;;  %v992_v17 = vld [vmem:[#allocation2 + $0x18] sm:$0xff]  ;;  %v994_v18 = vld [vmem:[#allocation2 + $0x20] sm:$0xff]  ;;  %v1008_v29 = vld [vmem:[#allocation2 + $0x28] sm:$0x3]  ;;  %v304_v32 = vadd.f32 %v293_v22, %v909_v46 }
  0xc9   :  { %v978_v10 = vsel %vm132_vm3, %v494_v5, %v496_v6  ;;  %v997_v23 = vsel %vm132_vm3, %v493_v14, %v494_v5  ;;  %v498_v25 = vrot.slane %v992_v17, 2  ;;  %v499_v26 = vrot.slane %v994_v18, 2 }
  0xca   :  { %v989_v15 = vsub.f32 %v949_v1, %v978_v10  ;;  %v1006_v28 = vsub.f32 %v982_v13, %v997_v23  ;;  %v501_v31 = vrot.slane %v1008_v29, 2  ;;  %v109_v5 = vrot.slane %v96_v50, 1 }
  0xcb   :  { %v1011_v30 = vsel %vm132_vm3, %v498_v25, %v499_v26  ;;  %v111_v6 = vrot.slane %v97_v51, 1  ;;  %v280_v14 = vmul.f32 2.0, %v925_v55  ;;  %v98_v25 = vmul.f32 2.0, %v853_v20 }
  0xcc   :  { %365 = vrot.lane.b32.xlu1 %v356_v7, %s772_s22  ;;  %387 = vrot.lane.b32.xlu0 %v968_v8, %s771_s2  ;;  %v536_v37 = vmul.f32 2.0, %v989_v15  ;;  %v1022_v38 = vsub.f32 %v992_v17, %v1011_v30  ;;  %v1026_v42 = vsel %vm132_vm3, %v499_v26, %v501_v31  ;;  %v535_v56 = vmul.f32 2.0, %v1006_v28 }
  0xcd   :  { %v1038_v47 = vsub.f32 %v994_v18, %v1026_v42  ;;  %v291_v7 = vsel %vm107_vm4, %v289_v58, %v290_v49  ;;  %v99_v26 = vmul.f32 2.0, %v859_v24  ;;  %v100_v31 = vmul.f32 2.0, %v864_v27 }
  0xce   :  { %v537_v52 = vmul.f32 2.0, %v1022_v38  ;;  %v294_v50 = vrot.slane %v280_v14, 1  ;;  %v113_v51 = vrot.slane %v98_v25, 1  ;;  %v1067_v57 = vadd.f32 %v935_v60, %v304_v32 }
  0xcf   :  { %v538_v62 = vmul.f32 2.0, %v1038_v47  ;;  %v460_v14 = vmul.f32 2.0, %v992_v17 }
  0xd0   :  { %369 = vrot.lane.b32.xlu1 %v358_v11, %s772_s22  ;;  %363 = vrot.lane.b32.xlu0 %v355_v12, %s772_s22  ;;  %v281_v11 = vmul.f32 2.0, %v918_v53  ;;  %v282_v12 = vmul.f32 2.0, %v920_v54  ;;  %v112_v54 = vsel %vm107_vm4, %v109_v5, %v111_v6 }
  0xd1   :  { %v123_v27 = vadd.f32 %v112_v54, %v855_v21  ;;  %v457_v21 = vmul.f32 2.0, %v982_v13 }
  0xd2   :  { %v295_v48 = vrot.slane %v281_v11, 1  ;;  %v297_v49 = vrot.slane %v282_v12, 1 }
  0xd3   :  { %v469_v12 = vrot.slane %v457_v21, 1 }
  0xd4   :  { %565 = vrot.lane.b32.xlu1 %v989_v15, %s771_s2  ;;  %367 = vrot.lane.b32.xlu0 %v357_v16, %s772_s22  ;;  %v108_v16 = vrot.slane %v95_v61, 1  ;;  %v458_v61 = vmul.f32 2.0, %v949_v1  ;;  %v296_v22 = vsel %vm107_vm4, %v294_v50, %v295_v48 }
  0xd5   :  { %v305_v6 = vadd.f32 %v296_v22, %v925_v55 }
  0xd6   :  { %v110_v41 = vsel %vm107_vm4, %v108_v16, %v109_v5  ;;  %v461_v16 = vmul.f32 2.0, %v994_v18 }
  0xd7   :  { %v122_v46 = vadd.f32 %v110_v41, %v851_v19  ;;  %v1081_v19 = vadd.f32 %v874_v33, %v123_v27  ;;  %v462_v33 = vmul.f32 2.0, %v1008_v29  ;;  %v1102_v55 = vadd.f32 %v954_v3, %v305_v6 }
  0xd8   :  { %389 = vrot.lane.b32.xlu1 %v972_v9, %s771_s2  ;;  %563 = vrot.lane.b32.xlu0 %v1006_v28, %s771_s2  ;;  %v475_v32 = vrot.slane %v461_v16, 1 }
  0xdc   :  { %545 = vrot.lane.b32.xlu1 %v536_v37, %s772_s22  ;;  %567 = vrot.lane.b32.xlu0 %v1022_v38, %s771_s2  ;;  %v303_v37 = vadd.f32 %v291_v7, %v907_v45  ;;  %v116_v45 = vrot.slane %v100_v31, 1  ;;  %v470_v7 = vrot.slane %v458_v61, 1  ;;  %v474_v31 = vrot.slane %v460_v14, 1 }
  0xde   :  { %v1070_v58 = vadd.f32 %v932_v59, %v303_v37  ;;  %v1084_v59 = vadd.f32 %v877_v34, %v122_v46  ;;  %v471_v29 = vsel %vm107_vm4, %v469_v12, %v470_v7  ;;  %v477_v37 = vrot.slane %v462_v33, 1 }
  0xdf   :  { %v476_v54 = vsel %vm107_vm4, %v474_v31, %v475_v32 }
  0xe0   :  { %547 = vrot.lane.b32.xlu1 %v537_v52, %s772_s22  ;;  %543 = vrot.lane.b32.xlu0 %v535_v56, %s772_s22  ;;  %v114_v52 = vrot.slane %v99_v26, 1  ;;  %v459_v56 = vmul.f32 2.0, %v951_v2  ;;  %v478_v41 = vsel %vm107_vm4, %v475_v32, %v477_v37 }
  0xe2   :  { %v117_v60 = vsel %vm107_vm4, %v114_v52, %v116_v45  ;;  %v115_v2 = vsel %vm107_vm4, %v113_v51, %v114_v52  ;;  %v472_v11 = vrot.slane %v459_v56, 1 }
  0xe3   :  { %v124_v34 = vadd.f32 %v115_v2, %v853_v20  ;;  %v125_v25 = vadd.f32 %v117_v60, %v859_v24 }
  0xe4   :  { %549 = vrot.lane.b32.xlu1 %v538_v62, %s772_s22  ;;  %207 = vrot.lane.b32.xlu0 %v905_v44, %s771_s2  ;;  %v298_v62 = vsel %vm107_vm4, %v295_v48, %v297_v49  ;;  %v473_v26 = vsel %vm107_vm4, %v470_v7, %v472_v11 }
  0xe5   :  { %v306_v5 = vadd.f32 %v298_v62, %v918_v53  ;;  %v1112_v20 = vadd.f32 %v888_v39, %v125_v25  ;;  %v1115_v3 = vadd.f32 %v891_v40, %v124_v34  ;;  %v484_v24 = vadd.f32 %v473_v26, %v949_v1 }
  0xe6   :  { %v485_v1 = vadd.f32 %v476_v54, %v992_v17 }
  0xe7   :  { %v1099_v53 = vadd.f32 %v957_v4, %v306_v5  ;;  %v483_v4 = vadd.f32 %v471_v29, %v982_v13  ;;  %v1126_v39 = vadd.f32 %v978_v10, %v484_v24  ;;  %v486_v13 = vadd.f32 %v478_v41, %v994_v18 }
  0xe8   :  { %209 = vrot.lane.b32.xlu1 %v901_v43, %s771_s2  ;;  %569 = vrot.lane.b32.xlu0 %v1038_v47, %s771_s2  ;;  %v1138_v48 = vadd.f32 %v1011_v30, %v485_v1 }
  0xe9   :  { %v1129_v40 = vadd.f32 %v997_v23, %v483_v4  ;;  %v1141_v49 = vadd.f32 %v1026_v42, %v486_v13 }
  0xec   :  { %341 = vrot.lane.b32.xlu1 %v1067_v57, %s773_s23  ;;  %339 = vrot.lane.b32.xlu0 %v1070_v58, %s773_s23 }
  0xf0   :  { %161 = vrot.lane.b32.xlu1 %v1081_v19, %s773_s23  ;;  %159 = vrot.lane.b32.xlu0 %v1084_v59, %s773_s23 }
  0xf4   :  { %345 = vrot.lane.b32.xlu1 %v1099_v53, %s773_s23  ;;  %343 = vrot.lane.b32.xlu0 %v1102_v55, %s773_s23 }
  0xf8   :  { %165 = vrot.lane.b32.xlu1 %v1112_v20, %s773_s23  ;;  %163 = vrot.lane.b32.xlu0 %v1115_v3, %s773_s23 }
  0xfc   :  { %521 = vrot.lane.b32.xlu1 %v1126_v39, %s773_s23  ;;  %519 = vrot.lane.b32.xlu0 %v1129_v40, %s773_s23 }
 0x100   :  { %523 = vrot.lane.b32.xlu1 %v1138_v48, %s773_s23  ;;  %525 = vrot.lane.b32.xlu0 %v1141_v49, %s773_s23 }
 0x12e   :  { %v206_v10 = vpop.permute.xlu0 %205  ;;  %v204_v17 = vpop.permute.xlu1 %203 }
 0x132   :  { %v186_v18 = vpop.permute.xlu1 %185  ;;  %v184_v23 = vpop.permute.xlu0 %183 }
 0x133   :  { %v196_v50 = vadd.f32 %v186_v18, %v881_v35  ;;  %v195_v51 = vadd.f32 %v184_v23, %v885_v36 }
 0x135   :  { %v216_v27 = vadd.f32 %v206_v10, %v196_v50  ;;  %v215_v30 = vadd.f32 %v204_v17, %v195_v51 }
 0x136   :  { %v190_v46 = vpop.permute.xlu1 %189  ;;  %v188_v52 = vpop.permute.xlu0 %187 }
 0x137   :  { %v224_v42 = vand.u32 2147483647, %v216_v27  ;;  %v223_v45 = vand.u32 2147483647, %v215_v30  ;;  %v197_v31 = vadd.f32 %v188_v52, %v905_v44  ;;  %v198_v1 = vadd.f32 %v190_v46, %v901_v43 }
 0x139   :  { %233 = vrot.lane.b32.xlu1 %v224_v42, %s773_s23  ;;  %231 = vrot.lane.b32.xlu0 %v223_v45, %s773_s23 }
 0x13a   :  { %v384_v56 = vpop.permute.xlu1 %383  ;;  %v386_v61 = vpop.permute.xlu0 %385 }
 0x13e   :  { %v366_v62 = vpop.permute.xlu1 %365  ;;  %v388_v22 = vpop.permute.xlu0 %387 }
 0x13f   :  { %v376_v21 = vadd.f32 %v366_v62, %v947_v0 }
 0x141   :  { %v396_v60 = vadd.f32 %v386_v61, %v376_v21 }
 0x142   :  { %v370_v35 = vpop.permute.xlu1 %369  ;;  %v364_v2 = vpop.permute.xlu0 %363 }
 0x143   :  { %v404_v36 = vand.u32 2147483647, %v396_v60  ;;  %v378_v7 = vadd.f32 %v370_v35, %v972_v9  ;;  %v375_v32 = vadd.f32 %v364_v2, %v943_v63 }
 0x145   :  { %413 = vrot.lane.b32.xlu1 %v404_v36, %s773_s23  ;;  %v395_v13 = vadd.f32 %v384_v56, %v375_v32 }
 0x146   :  { %v566_v5 = vpop.permute.xlu1 %565  ;;  %v368_v6 = vpop.permute.xlu0 %367 }
 0x147   :  { %v377_v10 = vadd.f32 %v368_v6, %v968_v8  ;;  %v403_v44 = vand.u32 2147483647, %v395_v13 }
 0x149   :  { %v397_v63 = vadd.f32 %v388_v22, %v377_v10 }
 0x14a   :  { %v390_v11 = vpop.permute.xlu1 %389  ;;  %v564_v12 = vpop.permute.xlu0 %563 }
 0x14b   :  { %v398_v14 = vadd.f32 %v390_v11, %v378_v7  ;;  %v405_v43 = vand.u32 2147483647, %v397_v63 }
 0x14d   :  { %v406_v16 = vand.u32 2147483647, %v398_v14 }
 0x14e   :  { %v546_v33 = vpop.permute.xlu1 %545  ;;  %v568_v34 = vpop.permute.xlu0 %567 }
 0x14f   :  { %417 = vrot.lane.b32.xlu1 %v406_v16, %s773_s23  ;;  %v556_v23 = vadd.f32 %v546_v33, %v989_v15 }
 0x151   :  { %v576_v51 = vadd.f32 %v566_v5, %v556_v23 }
 0x152   :  { %v548_v25 = vpop.permute.xlu1 %547  ;;  %v544_v0 = vpop.permute.xlu0 %543 }
 0x153   :  { %v557_v26 = vadd.f32 %v548_v25, %v1022_v38  ;;  %v555_v29 = vadd.f32 %v544_v0, %v1006_v28  ;;  %v584_v30 = vand.u32 2147483647, %v576_v51 }
 0x155   :  { %v575_v37 = vadd.f32 %v564_v12, %v555_v29  ;;  %v577_v4 = vadd.f32 %v568_v34, %v557_v26 }
 0x156   :  { %v550_v9 = vpop.permute.xlu1 %549  ;;  %v208_v24 = vpop.permute.xlu0 %207 }
 0x157   :  { %v583_v54 = vand.u32 2147483647, %v575_v37  ;;  %v217_v41 = vadd.f32 %v208_v24, %v197_v31  ;;  %v585_v28 = vand.u32 2147483647, %v577_v4  ;;  %v558_v27 = vadd.f32 %v550_v9, %v1038_v47 }
 0x159   :  { %v225_v17 = vand.u32 2147483647, %v217_v41  ;;  %591 = vrot.lane.b32.xlu1 %v583_v54, %s773_s23 }
 0x15a   :  { %v210_v38 = vpop.permute.xlu1 %209  ;;  %v570_v8 = vpop.permute.xlu0 %569 }
 0x15b   :  { %v218_v18 = vadd.f32 %v210_v38, %v198_v1  ;;  %235 = vrot.lane.b32.xlu0 %v225_v17, %s773_s23  ;;  %v578_v46 = vadd.f32 %v570_v8, %v558_v27 }
 0x15d   :  { %595 = vrot.lane.b32.xlu1 %v585_v28, %s773_s23  ;;  %v226_v50 = vand.u32 2147483647, %v218_v18  ;;  %v586_v52 = vand.u32 2147483647, %v578_v46 }
 0x15e   :  { %v342_v15 = vpop.permute.xlu1 %341  ;;  %v340_v45 = vpop.permute.xlu0 %339 }
 0x15f   :  { %411 = vrot.lane.b32.xlu0 %v403_v44, %s773_s23  ;;  %v351_v11 = vsub.f32 %v1070_v58, %v340_v45  ;;  %v352_v58 = vsub.f32 %v1067_v57, %v342_v15 }
 0x161   :  { %237 = vrot.lane.b32.xlu1 %v226_v50, %s773_s23  ;;  %v399_v34 = vand.u32 2147483647, %v351_v11  ;;  %v400_v38 = vand.u32 2147483647, %v352_v58 }
 0x162   :  { %v162_v42 = vpop.permute.xlu1 %161  ;;  %v160_v61 = vpop.permute.xlu0 %159 }
 0x163   :  { %415 = vrot.lane.b32.xlu0 %v405_v43, %s773_s23  ;;  %v171_v33 = vsub.f32 %v1084_v59, %v160_v61 }
 0x165   :  { %v219_v31 = vand.u32 2147483647, %v171_v33 }
 0x166   :  { %v346_v56 = vpop.permute.xlu1 %345  ;;  %v344_v22 = vpop.permute.xlu0 %343 }
 0x167   :  { %593 = vrot.lane.b32.xlu0 %v584_v30, %s773_s23  ;;  %v353_v25 = vsub.f32 %v1102_v55, %v344_v22  ;;  %v172_v55 = vsub.f32 %v1081_v19, %v162_v42 }
 0x169   :  { %v401_v4 = vand.u32 2147483647, %v353_v25  ;;  %v220_v63 = vand.u32 2147483647, %v172_v55 }
 0x16a   :  { %v166_v62 = vpop.permute.xlu1 %165  ;;  %v164_v60 = vpop.permute.xlu0 %163 }
 0x16b   :  { %597 = vrot.lane.b32.xlu0 %v586_v52, %s773_s23  ;;  %v173_v32 = vsub.f32 %v1115_v3, %v164_v60  ;;  %v354_v3 = vsub.f32 %v1099_v53, %v346_v56  ;;  %v174_v50 = vsub.f32 %v1112_v20, %v166_v62 }
 0x16d   :  { %v221_v13 = vand.u32 2147483647, %v173_v32  ;;  %v402_v8 = vand.u32 2147483647, %v354_v3 }
 0x16e   :  { %v522_v21 = vpop.permute.xlu1 %521  ;;  %v520_v47 = vpop.permute.xlu0 %519 }
 0x16f   :  { %v531_v12 = vsub.f32 %v1129_v40, %v520_v47  ;;  %v532_v40 = vsub.f32 %v1126_v39, %v522_v21 }
 0x171   :  { %v579_v0 = vand.u32 2147483647, %v531_v12  ;;  %v580_v28 = vand.u32 2147483647, %v532_v40 }
 0x172   :  { %v524_v35 = vpop.permute.xlu1 %523  ;;  %v526_v36 = vpop.permute.xlu0 %525 }
 0x173   :  { %v533_v26 = vsub.f32 %v1138_v48, %v524_v35  ;;  %v534_v57 = vsub.f32 %v1141_v49, %v526_v36  ;;  %v222_v49 = vand.u32 2147483647, %v174_v50 }
 0x175   :  { %v581_v54 = vand.u32 2147483647, %v533_v26  ;;  %v582_v27 = vand.u32 2147483647, %v534_v57 }
 0x1ab   :  { %v234_v2 = vpop.permute.xlu1 %233  ;;  %v232_v6 = vpop.permute.xlu0 %231 }
 0x1ac   :  { %v243_v59 = vadd.f32 %v232_v6, %v219_v31  ;;  %v244_v30 = vadd.f32 %v234_v2, %v220_v63 }
 0x1b7   :  { %v414_v5 = vpop.permute.xlu1 %413 }
 0x1b8   :  { %v424_v43 = vadd.f32 %v414_v5, %v400_v38 }
 0x1c1   :  { %v418_v7 = vpop.permute.xlu1 %417 }
 0x1c2   :  { %v426_v42 = vadd.f32 %v418_v7, %v402_v8 }
 0x1cb   :  { %v592_v14 = vpop.permute.xlu1 %591 }
 0x1cc   :  { %v603_v37 = vadd.f32 %v592_v14, %v579_v0 }
 0x1cd   :  { %v236_v16 = vpop.permute.xlu0 %235 }
 0x1ce   :  { %v245_v18 = vadd.f32 %v236_v16, %v221_v13 }
 0x1cf   :  { %v596_v24 = vpop.permute.xlu1 %595 }
 0x1d0   :  { %v605_v48 = vadd.f32 %v596_v24, %v581_v54 }
 0x1d1   :  { %v412_v29 = vpop.permute.xlu0 %411 }
 0x1d2   :  { %v423_v9 = vadd.f32 %v412_v29, %v399_v34 }
 0x1d3   :  { %v238_v52 = vpop.permute.xlu1 %237 }
 0x1d4   :  { %v607_v41 = vmax.f32 %v423_v9, %v603_v37  ;;  %v246_v61 = vadd.f32 %v238_v52, %v222_v49 }
 0x1d5   :  { %v416_v1 = vpop.permute.xlu0 %415 }
 0x1d6   :  { %v425_v10 = vadd.f32 %v416_v1, %v401_v4  ;;  %v611_v17 = vsub.f32 %v243_v59, %v607_v41 }
 0x1d8   :  { %v609_v39 = vmax.f32 %v425_v10, %v605_v48  ;;  %v615_v44 = vand.u32 2147483647, %v611_v17 }
 0x1d9   :  { %v594_v23 = vpop.permute.xlu0 %593 }
 0x1da   :  { %v604_v19 = vadd.f32 %v594_v23, %v580_v28  ;;  %623 = vrot.lane.b32.xlu0 %v615_v44, %s771_s2  ;;  %v613_v51 = vsub.f32 %v245_v18, %v609_v39 }
 0x1dc   :  { %v608_v46 = vmax.f32 %v424_v43, %v604_v19  ;;  %v617_v53 = vand.u32 2147483647, %v613_v51 }
 0x1dd   :  { %v598_v15 = vpop.permute.xlu0 %597 }
 0x1de   :  { %v606_v45 = vadd.f32 %v598_v15, %v582_v27  ;;  %627 = vrot.lane.b32.xlu0 %v617_v53, %s771_s2  ;;  %v612_v56 = vsub.f32 %v244_v30, %v608_v46 }
 0x1e0   :  { %v610_v20 = vmax.f32 %v426_v42, %v606_v45  ;;  %v616_v62 = vand.u32 2147483647, %v612_v56 }
 0x1e2   :  { %625 = vrot.lane.b32.xlu1 %v616_v62, %s771_s2  ;;  %v614_v22 = vsub.f32 %v246_v61, %v610_v20 }
 0x1e4   :  { %v618_v21 = vand.u32 2147483647, %v614_v22 }
 0x1e6   :  { %629 = vrot.lane.b32.xlu1 %v618_v21, %s771_s2 }
 0x24c   :  { %v624_v60 = vpop.permute.xlu0 %623 }
 0x24d   :  { %v636_v2 = vsel %vm635_vm5, %v624_v60, 0.0 }
 0x250   :  { %v628_v35 = vpop.permute.xlu0 %627 }
 0x251   :  { %v639_v6 = vsel %vm635_vm5, %v628_v35, 0.0 }
 0x254   :  { %v626_v47 = vpop.permute.xlu1 %625 }
 0x255   :  { %v637_v36 = vsel %vm635_vm5, %v626_v47, 0.0 }
 0x256   :  { %v638_v5 = vadd.f32 %v637_v36, %v636_v2 }
 0x258   :  { %v630_v7 = vpop.permute.xlu1 %629  ;;  %v640_v11 = vadd.f32 %v639_v6, %v638_v5 }
 0x259   :  { %v641_v12 = vsel %vm635_vm5, %v630_v7, 0.0 }
 0x25a   :  { %v642_v14 = vadd.f32 %v641_v12, %v640_v11 }
 0x25c   :  { %643 = vadd.xlane.f32.xlu0 %v642_v14 }
 0x2e9   :  { %v644_v16 = vpop.xlane.xlu0 %643 }
 0x2ea   :  { %v645_v33 = vrot.slane %v644_v16, 4 }
 0x2ec   :  { %v646_v34 = vadd.f32 %v645_v33, %v644_v16 }
 0x2ee   :  { %v647_v25 = vrot.slane %v646_v34, 2 }
 0x2f0   :  { %v648_v0 = vadd.f32 %v647_v25, %v646_v34 }
 0x2f2   :  { %v649_v26 = vrot.slane %v648_v0, 1 }
 0x2f4   :  { %v650_v29 = vadd.f32 %v649_v26, %v648_v0 }
 0x2f6   :  { %669 = vpush %v650_v29 }
 0x327   :  { %s670_s24 = spop %669 }
 0x328   :  { %653 = sst [smem:[#allocation9]] %s670_s24 }
 0x329   :  { %757 = shalt.err (!%p754_p12)
}
 0x32a   :  { %s774_s5 = smov [#allocation9]  }
 0x32b   :  { %661 = dma.smem_to_hbm %s774_s5, 16, %s1202_s3, [#allocation5]  }
 0x32c   :  { %762 = dma.done.wait [#allocation5], 16  }
 0x32d   :  { %763 = vsyncadd [#allocation5], 4294967280 }
 0x32e   :  { %665 = sfence }
 0x32f   :  { %666 = vsyncpa [#allocation4], 1 }
 0x330   :  { %667 = vsyncpa [#allocation7], 1 }
 0x331   :  { %668 = vsyncpa [#allocation5], 1 }

</bundles_post_ra>
